<compile_context>
chip_gen: v7x
topology: tpu7x:2x2x1
jax: 0.10.0
libtpu: 0.0.40
codegen_flags: <defaults>
</compile_context>

<pallas_src>
import math
import jax
import jax.numpy as jnp
from jax import lax
from jax.experimental import pallas as pl
from jax.experimental.pallas import tpu as pltpu


# ----------------------------- helpers -------------------------------------

def _round_up(x, m):
    return (x + m - 1) // m * m


def _tile(dim, tmax):
    """Pick a tile size and the padded extent for one GEMM dimension."""
    if dim <= tmax:
        return dim, dim            # full-dim block (always a legal block shape)
    return tmax, _round_up(dim, tmax)


# ----------------------------- tiled linear ---------------------------------

def linear_kernel(x_ref, wt_ref, b_ref, o_ref, acc_ref):
    # x: [tm, tk], wt: [tk, tn], b: [1, tn], o: [tm, tn], acc: [tm, tn] f32
    @pl.when(pl.program_id(2) == 0)
    def _():
        acc_ref[...] = jnp.zeros_like(acc_ref)

    acc_ref[...] += jnp.dot(
        x_ref[...], wt_ref[...], preferred_element_type=jnp.float32
    )

    @pl.when(pl.program_id(2) == pl.num_programs(2) - 1)
    def _():
        o_ref[...] = (acc_ref[...] + b_ref[...].astype(jnp.float32)).astype(o_ref.dtype)


def pallas_linear(x2d, wt, b, *, tm_max=256, tn_max=256, tk_max=512):
    """x2d: [M, K], wt: [K, N] (pre-transposed torch weight), b: [N] -> [M, N]."""
    M, K = x2d.shape
    N = wt.shape[1]

    tm, Mp = _tile(M, tm_max)
    tk, Kp = _tile(K, tk_max)
    tn, Np = _tile(N, tn_max)

    xp = x2d if (Mp == M and Kp == K) else jnp.pad(x2d, ((0, Mp - M), (0, Kp - K)))
    wp = wt if (Kp == K and Np == N) else jnp.pad(wt, ((0, Kp - K), (0, Np - N)))
    bp = (b if Np == N else jnp.pad(b, ((0, Np - N),))).reshape(1, Np)

    out = pl.pallas_call(
        linear_kernel,
        out_shape=jax.ShapeDtypeStruct((Mp, Np), x2d.dtype),
        grid=(Mp // tm, Np // tn, Kp // tk),
        in_specs=[
            pl.BlockSpec((tm, tk), lambda i, j, k: (i, k)),
            pl.BlockSpec((tk, tn), lambda i, j, k: (k, j)),
            pl.BlockSpec((1, tn), lambda i, j, k: (0, j)),
        ],
        out_specs=pl.BlockSpec((tm, tn), lambda i, j, k: (i, j)),
        scratch_shapes=[pltpu.VMEM((tm, tn), jnp.float32)],
        compiler_params=pltpu.CompilerParams(
            dimension_semantics=("parallel", "parallel", "arbitrary"),
        ),
    )(xp, wp, bp)

    if Mp != M or Np != N:
        out = out[:M, :N]
    return out


# ----------------------------- attention ------------------------------------

def pallas_attention(q, k, v, num_heads, *, tq_max=256):
    """q: [B, Sq, E], k/v: [B, Sk, E] -> (attended [B, Sq, E], weights [B, H, Sq, Sk])."""
    B, Sq, E = q.shape
    Sk = k.shape[1]
    H = num_heads
    D = E // H
    scale = 1.0 / math.sqrt(float(D))

    # Tile the query sequence; pad if necessary (padded rows sliced off afterwards).
    if Sq <= tq_max:
        tq, Sqp = Sq, Sq
    else:
        tq, Sqp = tq_max, _round_up(Sq, tq_max)
        q = jnp.pad(q, ((0, 0), (0, Sqp - Sq), (0, 0)))

    def attn_kernel(q_ref, k_ref, v_ref, attn_ref, out_ref):
        # q_ref: [1, tq, E], k_ref/v_ref: [1, Sk, E]
        # attn_ref: [1, H, tq, Sk], out_ref: [1, tq, E]
        qb = q_ref[0]
        kb = k_ref[0]
        vb = v_ref[0]
        head_outs = []
        for h in range(H):           # static unroll over heads
            lo, hi = h * D, (h + 1) * D
            qh = qb[:, lo:hi]        # [tq, D]
            kh = kb[:, lo:hi]        # [Sk, D]
            vh = vb[:, lo:hi]        # [Sk, D]
            # q @ k^T expressed as a contraction on the last dims (no explicit k.T)
            s = lax.dot_general(
                qh, kh, (((1,), (1,)), ((), ())),
                preferred_element_type=jnp.float32,
            ) * scale                                            # [tq, Sk]
            m = jnp.max(s, axis=-1, keepdims=True)
            e = jnp.exp(s - m)
            denom = jnp.sum(e, axis=-1, keepdims=True)
            p = e * pl.reciprocal(denom, approx=True)            # [tq, Sk]
            attn_ref[0, h] = p.astype(attn_ref.dtype)
            oh = jnp.dot(p.astype(vh.dtype), vh,
                         preferred_element_type=jnp.float32)     # [tq, D]
            head_outs.append(oh)
        # Lane-dense single store of the concatenated heads ([tq, E]).
        out_ref[0] = jnp.concatenate(head_outs, axis=-1).astype(out_ref.dtype)

    attn_w, attended = pl.pallas_call(
        attn_kernel,
        out_shape=(
            jax.ShapeDtypeStruct((B, H, Sqp, Sk), q.dtype),
            jax.ShapeDtypeStruct((B, Sqp, E), q.dtype),
        ),
        grid=(B, Sqp // tq),
        in_specs=[
            pl.BlockSpec((1, tq, E), lambda b, i: (b, i, 0)),
            pl.BlockSpec((1, Sk, E), lambda b, i: (b, 0, 0)),
            pl.BlockSpec((1, Sk, E), lambda b, i: (b, 0, 0)),
        ],
        out_specs=(
            pl.BlockSpec((1, H, tq, Sk), lambda b, i: (b, 0, i, 0)),
            pl.BlockSpec((1, tq, E), lambda b, i: (b, i, 0)),
        ),
        compiler_params=pltpu.CompilerParams(
            dimension_semantics=("parallel", "parallel"),
        ),
    )(q, k, v)

    if Sqp != Sq:
        attn_w = attn_w[:, :, :Sq, :]
        attended = attended[:, :Sq, :]
    return attended, attn_w


# ----------------------------- module wrapper --------------------------------

class MultiheadAttentionPallas:
    def __init__(self, embed_dim, num_heads, key, dropout=0.1):
        assert embed_dim % num_heads == 0, "embed_dim must be divisible by num_heads"
        self.embed_dim = embed_dim
        self.num_heads = num_heads
        self.head_dim = embed_dim // num_heads
        self.dropout_p = dropout  # TODO(synk): inference-mode identity only

        ks = jax.random.split(key, 8)
        bound = 1.0 / math.sqrt(embed_dim)

        def init_wt(k):  # torch layout [out, in], stored pre-transposed as [in, out]
            w = jax.random.uniform(k, (embed_dim, embed_dim), jnp.float32, -bound, bound)
            return jnp.asarray(w.T)

        def init_b(k):
            return jax.random.uniform(k, (embed_dim,), jnp.float32, -bound, bound)

        self.wq_t, self.bq = init_wt(ks[0]), init_b(ks[1])
        self.wk_t, self.bk = init_wt(ks[2]), init_b(ks[3])
        self.wv_t, self.bv = init_wt(ks[4]), init_b(ks[5])
        self.wo_t, self.bo = init_wt(ks[6]), init_b(ks[7])

        # Fused QKV parameters for the self-attention fast path (one GEMM, x read once).
        self.wqkv_t = jnp.concatenate([self.wq_t, self.wk_t, self.wv_t], axis=1)  # [E, 3E]
        self.bqkv = jnp.concatenate([self.bq, self.bk, self.bv], axis=0)          # [3E]

    def __call__(self, query, key, value, key_padding_mask=None):
        # TODO(synk): key_padding_mask not implemented (reference forward used with None).
        assert key_padding_mask is None
        B, Sq, E = query.shape
        Sk = key.shape[1]

        if (query is key) and (key is value):
            # Self-attention: one fused QKV GEMM.
            qkv = pallas_linear(query.reshape(B * Sq, E), self.wqkv_t, self.bqkv)  # [B*Sq, 3E]
            q = qkv[:, :E].reshape(B, Sq, E)
            k = qkv[:, E:2 * E].reshape(B, Sq, E)
            v = qkv[:, 2 * E:].reshape(B, Sq, E)
        else:
            q = pallas_linear(query.reshape(B * Sq, E), self.wq_t, self.bq).reshape(B, Sq, E)
            k = pallas_linear(key.reshape(B * Sk, E), self.wk_t, self.bk).reshape(B, Sk, E)
            v = pallas_linear(value.reshape(B * Sk, E), self.wv_t, self.bv).reshape(B, Sk, E)

        # Attention kernel consumes/produces [B, S, E] directly (head split/merge
        # handled inside the kernel -> no transpose round-trips through HBM).
        attended, attn_weights = pallas_attention(q, k, v, self.num_heads)

        # TODO(synk): dropout on attn_weights skipped (inference-mode identity).
        out = pallas_linear(attended.reshape(B * Sq, E), self.wo_t, self.bo).reshape(B, Sq, E)
        return out, attn_weights


# ----------------------------- demo ------------------------------------------

if __name__ == "__main__":
    B, S, E, H = 2, 8, 32, 4
    key = jax.random.PRNGKey(0)
    k_param, k_q, k_k, k_v = jax.random.split(key, 4)

    mha = MultiheadAttentionPallas(E, H, k_param)

    # Self-attention path (fused QKV GEMM).
    x = jax.random.normal(k_q, (B, S, E), jnp.float32)
    out_sa, attn_sa = mha(x, x, x)
    jax.block_until_ready(out_sa)
    jax.block_until_ready(attn_sa)
    assert out_sa.shape == (B, S, E)
    assert attn_sa.shape == (B, H, S, S)

    # Cross-attention path (separate tiled projections).
    query = jax.random.normal(k_q, (B, S, E), jnp.float32)
    key_in = jax.random.normal(k_k, (B, S, E), jnp.float32)
    value = jax.random.normal(k_v, (B, S, E), jnp.float32)
    out, attn_weights = mha(query, key_in, value)
    jax.block_until_ready(out)
    jax.block_until_ready(attn_weights)
    assert out.shape == (B, S, E)
    assert attn_weights.shape == (B, H, S, S)

    # Sanity: softmax rows sum to ~1 (approx reciprocal tolerance).
    row_sums = jnp.sum(attn_weights, axis=-1)
    assert bool(jnp.all(jnp.abs(row_sums - 1.0) < 1e-2))

    print("KERNEL_OK")
</pallas_src>

<mosaic_0001>
module attributes {stable_mosaic.version = 11 : i64} {
  func.func @linear_kernel(%arg0: i32, %arg1: i32, %arg2: i32, %arg3: memref<16x32xf32, #tpu.memory_space<vmem>>, %arg4: memref<32x96xf32, #tpu.memory_space<vmem>>, %arg5: memref<1x96xf32, #tpu.memory_space<vmem>>, %arg6: memref<16x96xf32, #tpu.memory_space<vmem>>, %arg7: memref<16x96xf32, #tpu.memory_space<vmem>>) attributes {dimension_semantics = [#tpu.dimension_semantics<parallel>, #tpu.dimension_semantics<parallel>, #tpu.dimension_semantics<arbitrary>], iteration_bounds = array<i64: 1, 1, 1>, scalar_prefetch = 0 : i64, scratch_operands = 1 : i64, tpu.core_type = #tpu.core_type<tc>, window_params = [{transform_indices = @transform_0, window_bounds = array<i64: 16, 32>}, {transform_indices = @transform_1, window_bounds = array<i64: 32, 96>}, {transform_indices = @transform_2, window_bounds = array<i64: 1, 96>}, {transform_indices = @transform_3, window_bounds = array<i64: 16, 96>}]} {
    %c0_i32 = arith.constant 0 : i32
    %0 = arith.cmpi eq, %arg2, %c0_i32 : i32
    %1 = arith.extui %0 : i1 to i32
    %c0_i32_0 = arith.constant 0 : i32
    %2 = arith.cmpi ne, %1, %c0_i32_0 : i32
    scf.if %2 {
      %cst_10 = arith.constant 0.000000e+00 : f32
      %12 = vector.broadcast %cst_10 : f32 to vector<16x96xf32>
      %c0_11 = arith.constant 0 : index
      %c0_12 = arith.constant 0 : index
      %13 = vector.load %arg7[%c0_11, %c0_12] : memref<16x96xf32, #tpu.memory_space<vmem>>, vector<16x96xf32>
      tpu.vector_store %arg7[%c0_11, %c0_12], %12 {strides = array<i32>} : memref<16x96xf32, #tpu.memory_space<vmem>>, vector<16x96xf32>,
    } else {
    }
    %c0 = arith.constant 0 : index
    %c0_1 = arith.constant 0 : index
    %3 = vector.load %arg7[%c0, %c0_1] : memref<16x96xf32, #tpu.memory_space<vmem>>, vector<16x96xf32>
    %c0_2 = arith.constant 0 : index
    %c0_3 = arith.constant 0 : index
    %4 = vector.load %arg3[%c0_2, %c0_3] : memref<16x32xf32, #tpu.memory_space<vmem>>, vector<16x32xf32>
    %c0_4 = arith.constant 0 : index
    %c0_5 = arith.constant 0 : index
    %5 = vector.load %arg4[%c0_4, %c0_5] : memref<32x96xf32, #tpu.memory_space<vmem>>, vector<32x96xf32>
    %cst = arith.constant dense<0.000000e+00> : vector<16x96xf32>
    %6 = tpu.matmul %4, %5, %cst {dimension_numbers = #tpu.dot_dimension_numbers<[1], [0], [0], [1], [0, 0, 1, 1], [], []>} : vector<16x32xf32>, vector<32x96xf32>, vector<16x96xf32> -> vector<16x96xf32>
    %7 = arith.addf %3, %6 : vector<16x96xf32>
    %c0_6 = arith.constant 0 : index
    %c0_7 = arith.constant 0 : index
    %8 = vector.load %arg7[%c0_6, %c0_7] : memref<16x96xf32, #tpu.memory_space<vmem>>, vector<16x96xf32>
    tpu.vector_store %arg7[%c0_6, %c0_7], %7 {strides = array<i32>} : memref<16x96xf32, #tpu.memory_space<vmem>>, vector<16x96xf32>,
    %c0_i32_8 = arith.constant 0 : i32
    %9 = arith.cmpi eq, %arg2, %c0_i32_8 : i32
    %10 = arith.extui %9 : i1 to i32
    %c0_i32_9 = arith.constant 0 : i32
    %11 = arith.cmpi ne, %10, %c0_i32_9 : i32
    scf.if %11 {
      %c0_10 = arith.constant 0 : index
      %c0_11 = arith.constant 0 : index
      %12 = vector.load %arg7[%c0_10, %c0_11] : memref<16x96xf32, #tpu.memory_space<vmem>>, vector<16x96xf32>
      %c0_12 = arith.constant 0 : index
      %c0_13 = arith.constant 0 : index
      %13 = vector.load %arg5[%c0_12, %c0_13] : memref<1x96xf32, #tpu.memory_space<vmem>>, vector<1x96xf32>
      %14 = vector.broadcast %13 : vector<1x96xf32> to vector<16x96xf32>
      %15 = arith.addf %12, %14 : vector<16x96xf32>
      %c0_14 = arith.constant 0 : index
      %c0_15 = arith.constant 0 : index
      %16 = vector.load %arg6[%c0_14, %c0_15] : memref<16x96xf32, #tpu.memory_space<vmem>>, vector<16x96xf32>
      tpu.vector_store %arg6[%c0_14, %c0_15], %15 {strides = array<i32>} : memref<16x96xf32, #tpu.memory_space<vmem>>, vector<16x96xf32>,
    } else {
    }
    return
  }
  func.func @transform_0(%arg0: i32, %arg1: i32, %arg2: i32) -> (i32, i32) {
    %c0_i32 = arith.constant 0 : i32
    return %arg0, %arg2 : i32, i32
  }
  func.func @transform_1(%arg0: i32, %arg1: i32, %arg2: i32) -> (i32, i32) {
    %c0_i32 = arith.constant 0 : i32
    return %arg2, %arg1 : i32, i32
  }
  func.func @transform_2(%arg0: i32, %arg1: i32, %arg2: i32) -> (i32, i32) {
    %c0_i32 = arith.constant 0 : i32
    %c0_i32_0 = arith.constant 0 : i32
    return %c0_i32, %arg1 : i32, i32
  }
  func.func @transform_3(%arg0: i32, %arg1: i32, %arg2: i32) -> (i32, i32) {
    %c0_i32 = arith.constant 0 : i32
    return %arg0, %arg1 : i32, i32
  }
}

</mosaic_0001>

<bundles_post_ra>
// kernel: tpu_custom_call.1
= control target key start
LH: loop header
LB: loop body
LE: loop exit
PB: predicated region body
PF: predicated region fallthrough
CT: control target
= control target key end

     0   :  { %8 = vsyncpa [#allocation4], 0  ;;  %s365_s0 = inlined_call_operand.hbm [shape: f32[16,32], index: 0, kind: input, shape index: {}]   ;;  %s366_s1 = inlined_call_operand.hbm [shape: f32[32,96], index: 1, kind: input, shape index: {}]   ;;  %s367_s2 = inlined_call_operand.vmem [shape: f32[1,96], index: 2, kind: input, shape index: {}]   ;;  %s368_s3 = inlined_call_operand.hbm [shape: f32[16,96], index: 3, kind: output, shape index: {}]  }
   0x1   :  { %9 = vsyncpa [#allocation7], 0 }
   0x2   :  { %10 = vsyncpa [#allocation5], 0  ;;  %s285_s12 = smov [#allocation3]   ;;  %s213_s16 = scalar_lea.hbm %s365_s0, 256 }
   0x3   :  { %s16_s13 = sshll.u32 %s285_s12, 4  ;;  %p214_p0 = scmp.ne.s32.totalorder %s365_s0, %s213_s16  ;;  %s17_s13 = int_to_ptr.vmem [resolvable:$true] %s16_s13 }
   0x4   :  { %p217_p1 = scmp.lt.u32.totalorder %s213_s16, %s365_s0 }
   0x6   :  { %p219_p2 = pnand %p217_p1, %p214_p0 }
   0x8   :  { %222 = shalt.err (!%p219_p2)
}
   0x9   :  { %s223_s21 = scalar_lea.vmem %s17_s13, 256  ;;  %p228_p4 = scmp.lt.s32.totalorder %s17_s13, %s17_s13 }
   0xa   :  { %p224_p3 = scmp.ne.s32.totalorder %s17_s13, %s223_s21  ;;  %p229_p5 = scmp.lt.s32.totalorder %s223_s21, %s223_s21 }
   0xc   :  { %p230_p6 = por %p229_p5, %p228_p4 }
   0xe   :  { %p231_p7 = pnand %p230_p6, %p224_p3 }
  0x10   :  { %234 = shalt.err (!%p231_p7)
}
  0x11   :  { %s286_s22 = smov 128   ;;  %s287_s23 = smov 8  }
  0x12   :  { %22 = dma.hbm_to_vmem [thread:$0]  %s365_s0, 256, %s17_s13, [#allocation4], %s286_s22, %s286_s22, %s287_s23  }
  0x13   :  { %s288_s26 = smov [#allocation6]   ;;  %s235_s30 = scalar_lea.hbm %s366_s1, 512 }
  0x14   :  { %s28_s27 = sshll.u32 %s288_s26, 4  ;;  %p236_p8 = scmp.ne.s32.totalorder %s366_s1, %s235_s30  ;;  %s29_s27 = int_to_ptr.vmem [resolvable:$true] %s28_s27 }
  0x15   :  { %p239_p9 = scmp.lt.u32.totalorder %s235_s30, %s366_s1 }
  0x17   :  { %p241_p10 = pnand %p239_p9, %p236_p8 }
  0x19   :  { %244 = shalt.err (!%p241_p10)
}
  0x1a   :  { %s245_s8 = scalar_lea.vmem %s29_s27, 512  ;;  %p250_p12 = scmp.lt.s32.totalorder %s29_s27, %s29_s27 }
  0x1b   :  { %p246_p11 = scmp.ne.s32.totalorder %s29_s27, %s245_s8  ;;  %p251_p13 = scmp.lt.s32.totalorder %s245_s8, %s245_s8 }
  0x1d   :  { %p252_p0 = por %p251_p13, %p250_p12 }
  0x1f   :  { %p253_p1 = pnand %p252_p0, %p246_p11 }
  0x21   :  { %256 = shalt.err (!%p253_p1)
}
  0x22   :  { %34 = dma.hbm_to_vmem [thread:$0]  %s366_s1, 512, %s29_s27, [#allocation7], %s286_s22, %s286_s22, %s287_s23  }
  0x23   :  { %279 = dma.done.wait [#allocation4], 256  }
  0x24   :  { %280 = vsyncadd [#allocation4], 4294967040 }
  0x25   :  { %281 = dma.done.wait [#allocation7], 512  }
  0x26   :  { %282 = vsyncadd [#allocation7], 4294966784  ;;  %vm47_vm0 = vcmask 785408   ;;  %v289_v0 = vmov 0.0   ;;  %vm58_vm1 = vcmask 261120   ;;  %v54_v1 = vld [vmem:[#allocation6] sm:$0xff] }
  0x27   :  { %49 = vst.msk [vmem:[#allocation2 + $0x8] sm:$0xff] %vm47_vm0, %v289_v0  ;;  %48 = vst.msk [vmem:[#allocation2] sm:$0xff] %vm47_vm0, %v289_v0  ;;  %v55_v2 = vld [vmem:[#allocation6 + $0x8] sm:$0xff]  ;;  %v56_v3 = vld [vmem:[#allocation6 + $0x10] sm:$0xff]  ;;  %s290_s11 = smov [#allocation8]  }
  0x28   :  { %v199_v4 = vpack.c.bf16 %v55_v2, %v54_v1  ;;  %v57_v5 = vld [vmem:[#allocation6 + $0x18] sm:$0xff]  ;;  %v52_v6 = vld [vmem:[#allocation3] sm:$0xff]  ;;  %v181_v15 = vld [vmem:[%s367_s2] ss:$0 sm:$0xff]  ;;  %s166_s12 = sshll.u32 %s290_s11, 4  ;;  %s167_s12 = int_to_ptr.vmem [resolvable:$true] %s166_s12 }
  0x29   :  { %v203_v7 = vpack.c.bf16 %v57_v5, %v56_v3  ;;  %196 = vmatprep.mubr.msk.f32.mxu0 %vm58_vm1, %v52_v6  ;;  %v53_v8 = vld [vmem:[#allocation3 + $0x8] sm:$0xff]  ;;  %s257_s13 = scalar_lea.vmem %s167_s12, 256  ;;  %p262_p3 = scmp.lt.s32.totalorder %s167_s12, %s167_s12 }
  0x2a   :  { %200 = vmatprep.subr.bf16.mxu0 %v199_v4  ;;  %p258_p2 = scmp.ne.s32.totalorder %s167_s12, %s257_s13  ;;  %p263_p4 = scmp.lt.s32.totalorder %s257_s13, %s257_s13 }
  0x2b   :  { %202 = vmatpush3.bf16.msra.mxu0 %v199_v4 }
  0x2c   :  { %204 = vmatprep.subr.bf16.mxu0 %v203_v7  ;;  %p264_p5 = por %p263_p4, %p262_p3 }
  0x2e   :  { %v51_v9 = vld [vmem:[#allocation2 + $0x8] sm:$0xff]  ;;  %v50_v10 = vld [vmem:[#allocation2] sm:$0xff]  ;;  %p265_p6 = pnand %p264_p5, %p258_p2 }
  0x2f   :  { %206 = vmatpush3.bf16.msra.mxu0 %v203_v7 }
  0x32   :  { %197 = vmatmul.mubr.msk.f32.vlgmr.msra.gmra.mrb[0].mxu0 %vm58_vm1, %v53_v8 }
 0x105   :  { %v198_v11 = vpop.f32.mrb[0].mxu0 }
 0x106   :  { %v141_v12 = vadd.f32 %v198_v11, %v51_v9  ;;  %v131_v13 = vpop.f32.mrb[1].mxu0 }
 0x107   :  { %v140_v14 = vadd.f32 %v131_v13, %v50_v10 }
 0x108   :  { %144 = vst.msk [vmem:[#allocation2 + $0x8] sm:$0xff] %vm47_vm0, %v141_v12 }
 0x109   :  { %143 = vst.msk [vmem:[#allocation2] sm:$0xff] %vm47_vm0, %v140_v14 }
 0x10f   :  { %v149_v16 = vld [vmem:[#allocation2 + $0x8] sm:$0xff] }
 0x110   :  { %v148_v17 = vld [vmem:[#allocation2] sm:$0xff]  ;;  %v158_v18 = vadd.f32 %v181_v15, %v149_v16 }
 0x111   :  { %v157_v19 = vadd.f32 %v181_v15, %v148_v17 }
 0x112   :  { %160 = vst.msk [vmem:[#allocation8 + $0x8] sm:$0xff] %vm47_vm0, %v158_v18 }
 0x113   :  { %159 = vst.msk [vmem:[#allocation8] sm:$0xff] %vm47_vm0, %v157_v19 }
 0x114   :  { %268 = shalt.err (!%p265_p6)
}
 0x115   :  { %s269_s15 = scalar_lea.hbm %s368_s3, 256 }
 0x116   :  { %p270_p7 = scmp.ne.s32.totalorder %s368_s3, %s269_s15  ;;  %p273_p8 = scmp.lt.u32.totalorder %s269_s15, %s368_s3 }
 0x118   :  { %p275_p9 = pnand %p273_p8, %p270_p7 }
 0x11a   :  { %278 = shalt.err (!%p275_p9)
}
 0x11b   :  { %172 = dma.vmem_to_hbm [thread:$0]  %s167_s12, 256, %s368_s3, [#allocation5], %s286_s22, %s286_s22, %s287_s23  }
 0x11c   :  { %283 = dma.done.wait [#allocation5], 256  }
 0x11d   :  { %284 = vsyncadd [#allocation5], 4294967040 }
 0x11e   :  { %176 = vsyncpa [#allocation4], 1 }
 0x11f   :  { %177 = vsyncpa [#allocation7], 1 }
 0x120   :  { %178 = vsyncpa [#allocation5], 1 }

</bundles_post_ra>
